<compile_context>
chip_gen: v6e
topology: v6e:2x2x1
jax: 0.10.0
libtpu: 0.0.40
codegen_flags: <defaults>
</compile_context>

<pallas_src>
import jax
import jax.numpy as jnp
from jax.experimental import pallas as pl
from jax.experimental.pallas import tpu as pltpu


def _round_up(x, m):
    return -(-x // m) * m


# ---------------------------------------------------------------------------
# Kernels
# ---------------------------------------------------------------------------
def _forward_logits(x_ref, w1_ref, b1_ref, w2_ref, b2_ref):
    """linear1 -> sigmoid -> softmax(hidden dim) -> linear2, all in f32."""
    # linear1 + sigmoid (exp / reciprocal issue on the EUP slot; exact vrcp is free)
    pre = jnp.dot(x_ref[...], w1_ref[...],
                  preferred_element_type=jnp.float32) + b1_ref[...]
    h = pl.reciprocal(1.0 + jnp.exp(-pre))                       # sigmoid, exact

    # softmax over the hidden dim: h is in (0,1) so exp cannot overflow ->
    # skip the max-subtraction (saves one XLU reduce + one VPU subtract).
    e = jnp.exp(h)
    h = e * pl.reciprocal(jnp.sum(e, axis=1, keepdims=True))

    # linear2 -> (TB, n_cls) logits
    return jnp.dot(h, w2_ref[...],
                   preferred_element_type=jnp.float32) + b2_ref[...]


def mlp_infer_kernel(x_ref, w1_ref, b1_ref, w2_ref, b2_ref, probs_ref):
    """Inference path: store softmax probabilities over the real classes only."""
    logits = _forward_logits(x_ref, w1_ref, b1_ref, w2_ref, b2_ref)
    z = jnp.exp(logits - jnp.max(logits, axis=1, keepdims=True))
    probs_ref[...] = z * pl.reciprocal(jnp.sum(z, axis=1, keepdims=True))


def mlp_loss_kernel(x_ref, y_ref, w1_ref, b1_ref, w2_ref, b2_ref, picked_ref):
    """CE path: fuse the target-class gather; emit per-row picked log-prob only."""
    logits = _forward_logits(x_ref, w1_ref, b1_ref, w2_ref, b2_ref)
    z = logits - jnp.max(logits, axis=1, keepdims=True)
    logp = z - jnp.log(jnp.sum(jnp.exp(z), axis=1, keepdims=True))
    cls = jax.lax.broadcasted_iota(jnp.int32, logp.shape, 1)      # (TB, n_cls)
    mask = cls == y_ref[...]                                      # (TB,1) broadcast
    # Padded rows carry y = -1 -> mask all-false -> contribute exactly 0.
    picked_ref[...] = jnp.sum(jnp.where(mask, logp, 0.0), axis=1, keepdims=True)


# ---------------------------------------------------------------------------
# Tiling / wrapper
# ---------------------------------------------------------------------------
def _plan_tiling(B, in_dim, hidden, n_cls, tb):
    try:
        vmem_cap = int(pltpu.get_tpu_info().vmem_capacity_bytes)
    except Exception:
        vmem_cap = 64 << 20                      # v7x worst case (64 MiB per TC)
    vmem_limit = int(vmem_cap * 3 // 4)          # explicit scoped limit, 25% headroom

    if tb is None:
        # Residents (count twice in case single-buffering is unavailable).
        resident = 4 * (in_dim * hidden + hidden + hidden * n_cls + n_cls)
        # Per-row VMEM: double-buffered x / y / out tiles + ~3 hidden-wide temporaries.
        per_row = 4 * (2 * in_dim + 2 * (n_cls + 1) + 3 * hidden)
        budget = max(vmem_limit - 2 * resident - (2 << 20), per_row * 8)
        tb_fit = max(8, (budget // per_row) // 8 * 8)
        # >= 2 grid tiles so ("parallel",) splits the batch across v7x's 2 TCs.
        tb_two_tiles = max(8, _round_up(pl.cdiv(B, 2), 8))
        tb = min(1024, tb_fit, tb_two_tiles)

    assert tb % 8 == 0, "batch tile must be a multiple of 8 sublanes"
    n_tiles = pl.cdiv(B, tb)
    b_pad = n_tiles * tb
    return tb, n_tiles, b_pad, vmem_limit


def torch_model_forward(x, params, y=None, *, tb=None):
    """Mirrors TorchModel.forward.

    y is None -> softmax(linear2(softmax(sigmoid(linear1(x)))))  (B, 5)
    y given   -> scalar CrossEntropyLoss on the pre-softmax logits (mean reduction)
    """
    w1, b1, w2, b2 = params        # w1:(in,hidden) b1:(1,hidden) w2:(hidden,5) b2:(1,5)
    B, in_dim = x.shape
    hidden = w1.shape[1]
    n_cls = w2.shape[1]

    tb, n_tiles, b_pad, vmem_limit = _plan_tiling(B, in_dim, hidden, n_cls, tb)
    if b_pad != B:
        x = jnp.pad(x, ((0, b_pad - B), (0, 0)))

    cparams = pltpu.CompilerParams(
        dimension_semantics=("parallel",),       # megacore batch split on v7x
        vmem_limit_bytes=vmem_limit,
    )
    cost = pl.CostEstimate(
        flops=2 * b_pad * (in_dim * hidden + hidden * n_cls),
        transcendentals=b_pad * (3 * hidden + n_cls + 3),
        bytes_accessed=4 * (b_pad * in_dim + in_dim * hidden + hidden
                            + hidden * n_cls + n_cls + b_pad * n_cls),
    )

    def weight_specs(pm):
        kw = {} if pm is None else dict(pipeline_mode=pm)
        return [
            pl.BlockSpec((in_dim, hidden), lambda i: (0, 0), **kw),   # w1 resident
            pl.BlockSpec((1, hidden), lambda i: (0, 0), **kw),        # b1 resident
            pl.BlockSpec((hidden, n_cls), lambda i: (0, 0), **kw),    # w2 resident
            pl.BlockSpec((1, n_cls), lambda i: (0, 0), **kw),         # b2 resident
        ]

    x_spec = pl.BlockSpec((tb, in_dim), lambda i: (i, 0))

    if y is None:
        def run(pm):
            return pl.pallas_call(
                mlp_infer_kernel,
                out_shape=jax.ShapeDtypeStruct((b_pad, n_cls), jnp.float32),
                grid=(n_tiles,),
                in_specs=[x_spec] + weight_specs(pm),
                out_specs=pl.BlockSpec((tb, n_cls), lambda i: (i, 0)),
                compiler_params=cparams,
                cost_estimate=cost,
            )(x, w1, b1, w2, b2)

        try:
            probs = run(pl.Buffered(buffer_count=1))   # weights fetched once
        except Exception:
            probs = run(None)                          # fallback: default buffering
        return probs[:B]

    # --- fused CrossEntropy path -------------------------------------------
    # Targets travel with the batch tile; padded rows get label -1 (never matches).
    y2d = jnp.full((b_pad, 1), -1, jnp.int32).at[:B, 0].set(y.astype(jnp.int32))

    def run(pm):
        return pl.pallas_call(
            mlp_loss_kernel,
            out_shape=jax.ShapeDtypeStruct((b_pad, 1), jnp.float32),
            grid=(n_tiles,),
            in_specs=[x_spec, pl.BlockSpec((tb, 1), lambda i: (i, 0))] + weight_specs(pm),
            out_specs=pl.BlockSpec((tb, 1), lambda i: (i, 0)),
            compiler_params=cparams,
            cost_estimate=cost,
        )(x, y2d, w1, b1, w2, b2)

    try:
        picked = run(pl.Buffered(buffer_count=1))
    except Exception:
        picked = run(None)
    # Padded rows contribute exactly 0; divide by the real batch size.
    return -jnp.sum(picked) / B


# ---------------------------------------------------------------------------
# Params / reference / demo
# ---------------------------------------------------------------------------
def init_params(key, input_size, hidden_size, n_cls=5):
    # PyTorch nn.Linear init ranges; weights stored pre-transposed as (in, out).
    k1, k2, k3, k4 = jax.random.split(key, 4)
    bound1 = 1.0 / jnp.sqrt(input_size)
    bound2 = 1.0 / jnp.sqrt(hidden_size)
    w1 = jax.random.uniform(k1, (input_size, hidden_size), jnp.float32, -bound1, bound1)
    b1 = jax.random.uniform(k2, (1, hidden_size), jnp.float32, -bound1, bound1)
    w2 = jax.random.uniform(k3, (hidden_size, n_cls), jnp.float32, -bound2, bound2)
    b2 = jax.random.uniform(k4, (1, n_cls), jnp.float32, -bound2, bound2)
    return w1, b1, w2, b2


def _ref_forward(x, params, y=None):
    """Pure-JAX reference of TorchModel.forward for validation."""
    w1, b1, w2, b2 = params
    h = jax.nn.sigmoid(x @ w1 + b1)
    h = jax.nn.softmax(h, axis=1)
    logits = h @ w2 + b2
    if y is None:
        return jax.nn.softmax(logits, axis=1)
    logp = jax.nn.log_softmax(logits, axis=1)
    return -jnp.mean(jnp.take_along_axis(logp, y[:, None], axis=1))


if __name__ == "__main__":
    key = jax.random.PRNGKey(0)
    B, input_size, hidden_size = 64, 32, 32

    kx, ky, kp = jax.random.split(key, 3)
    x = jax.random.normal(kx, (B, input_size), jnp.float32)
    y = jax.random.randint(ky, (B,), 0, 5)
    params = init_params(kp, input_size, hidden_size)

    # Inference path (y is None): softmax probabilities over 5 classes.
    probs = jax.block_until_ready(torch_model_forward(x, params))
    # Training path (y given): CrossEntropyLoss scalar (gather fused in-kernel).
    loss = jax.block_until_ready(torch_model_forward(x, params, y))

    # Hard invariants.
    assert probs.shape == (B, 5)
    assert bool(jnp.allclose(jnp.sum(probs, axis=1), 1.0, atol=1e-5))
    assert bool(jnp.isfinite(loss))

    # Cross-check against the pure-JAX reference (exact EUP reciprocal -> tight tol;
    # residual slack only covers MXU f32-matmul precision differences).
    assert bool(jnp.allclose(probs, _ref_forward(x, params), atol=2e-3))
    assert bool(jnp.allclose(loss, _ref_forward(x, params, y), atol=2e-3))

    # Ragged batch (not a multiple of the tile): exercises padding + masked rows.
    xr, yr = x[:50], y[:50]
    pr = jax.block_until_ready(torch_model_forward(xr, params))
    lr = jax.block_until_ready(torch_model_forward(xr, params, yr))
    assert pr.shape == (50, 5)
    assert bool(jnp.allclose(pr, _ref_forward(xr, params), atol=2e-3))
    assert bool(jnp.allclose(lr, _ref_forward(xr, params, yr), atol=2e-3))

    print("KERNEL_OK")
</pallas_src>

<mosaic_0001>
module attributes {stable_mosaic.version = 11 : i64} {
  func.func @mlp_infer_kernel(%arg0: i32, %arg1: memref<32x32xf32, #tpu.memory_space<vmem>>, %arg2: memref<32x32xf32, #tpu.memory_space<vmem>>, %arg3: memref<1x32xf32, #tpu.memory_space<vmem>>, %arg4: memref<32x5xf32, #tpu.memory_space<vmem>>, %arg5: memref<1x5xf32, #tpu.memory_space<vmem>>, %arg6: memref<32x5xf32, #tpu.memory_space<vmem>>) attributes {dimension_semantics = [#tpu.dimension_semantics<parallel>], iteration_bounds = array<i64: 2>, scalar_prefetch = 0 : i64, scratch_operands = 0 : i64, tpu.core_type = #tpu.core_type<tc>, window_params = [{transform_indices = @transform_0, window_bounds = array<i64: 32, 32>}, {pipeline_mode = #tpu.pipeline_mode<synchronous>, transform_indices = @transform_1, window_bounds = array<i64: 32, 32>}, {pipeline_mode = #tpu.pipeline_mode<synchronous>, transform_indices = @transform_2, window_bounds = array<i64: 1, 32>}, {pipeline_mode = #tpu.pipeline_mode<synchronous>, transform_indices = @transform_3, window_bounds = array<i64: 32, 5>}, {pipeline_mode = #tpu.pipeline_mode<synchronous>, transform_indices = @transform_4, window_bounds = array<i64: 1, 5>}, {transform_indices = @transform_5, window_bounds = array<i64: 32, 5>}]} {
    %c0 = arith.constant 0 : index
    %c0_0 = arith.constant 0 : index
    %0 = vector.load %arg1[%c0, %c0_0] : memref<32x32xf32, #tpu.memory_space<vmem>>, vector<32x32xf32>
    %c0_1 = arith.constant 0 : index
    %c0_2 = arith.constant 0 : index
    %1 = vector.load %arg2[%c0_1, %c0_2] : memref<32x32xf32, #tpu.memory_space<vmem>>, vector<32x32xf32>
    %cst = arith.constant dense<0.000000e+00> : vector<32x32xf32>
    %2 = tpu.matmul %0, %1, %cst {dimension_numbers = #tpu.dot_dimension_numbers<[1], [0], [0], [1], [0, 0, 1, 1], [], []>} : vector<32x32xf32>, vector<32x32xf32>, vector<32x32xf32> -> vector<32x32xf32>
    %c0_3 = arith.constant 0 : index
    %c0_4 = arith.constant 0 : index
    %3 = vector.load %arg3[%c0_3, %c0_4] : memref<1x32xf32, #tpu.memory_space<vmem>>, vector<1x32xf32>
    %4 = vector.broadcast %3 : vector<1x32xf32> to vector<32x32xf32>
    %5 = arith.addf %2, %4 : vector<32x32xf32>
    %cst_5 = arith.constant 0.000000e+00 : f32
    %6 = vector.broadcast %cst_5 : f32 to vector<32x32xf32>
    %7 = arith.subf %6, %5 : vector<32x32xf32>
    %8 = math.exp %7 : vector<32x32xf32>
    %cst_6 = arith.constant 1.000000e+00 : f32
    %9 = vector.broadcast %cst_6 : f32 to vector<32x32xf32>
    %10 = arith.addf %9, %8 : vector<32x32xf32>
    %11 = tpu.reciprocal %10 : vector<32x32xf32> -> vector<32x32xf32>
    %12 = math.exp %11 : vector<32x32xf32>
    %cst_7 = arith.constant dense<0.000000e+00> : vector<32xf32>
    %13 = vector.multi_reduction <add>, %12, %cst_7 [1] : vector<32x32xf32> to vector<32xf32>
    %14 = vector.shape_cast %13 : vector<32xf32> to vector<32x1xf32>
    %15 = tpu.reciprocal %14 : vector<32x1xf32> -> vector<32x1xf32>
    %16 = vector.broadcast %15 : vector<32x1xf32> to vector<32x32xf32>
    %17 = arith.mulf %12, %16 : vector<32x32xf32>
    %c0_8 = arith.constant 0 : index
    %c0_9 = arith.constant 0 : index
    %18 = vector.load %arg4[%c0_8, %c0_9] : memref<32x5xf32, #tpu.memory_space<vmem>>, vector<32x5xf32>
    %cst_10 = arith.constant dense<0.000000e+00> : vector<32x5xf32>
    %19 = tpu.matmul %17, %18, %cst_10 {dimension_numbers = #tpu.dot_dimension_numbers<[1], [0], [0], [1], [0, 0, 1, 1], [], []>} : vector<32x32xf32>, vector<32x5xf32>, vector<32x5xf32> -> vector<32x5xf32>
    %c0_11 = arith.constant 0 : index
    %c0_12 = arith.constant 0 : index
    %20 = vector.load %arg5[%c0_11, %c0_12] : memref<1x5xf32, #tpu.memory_space<vmem>>, vector<1x5xf32>
    %21 = vector.broadcast %20 : vector<1x5xf32> to vector<32x5xf32>
    %22 = arith.addf %19, %21 : vector<32x5xf32>
    %cst_13 = arith.constant dense<0xFF800000> : vector<32xf32>
    %23 = vector.multi_reduction <maximumf>, %22, %cst_13 [1] : vector<32x5xf32> to vector<32xf32>
    %24 = vector.shape_cast %23 : vector<32xf32> to vector<32x1xf32>
    %25 = vector.broadcast %24 : vector<32x1xf32> to vector<32x5xf32>
    %26 = arith.subf %22, %25 : vector<32x5xf32>
    %27 = math.exp %26 : vector<32x5xf32>
    %cst_14 = arith.constant dense<0.000000e+00> : vector<32xf32>
    %28 = vector.multi_reduction <add>, %27, %cst_14 [1] : vector<32x5xf32> to vector<32xf32>
    %29 = vector.shape_cast %28 : vector<32xf32> to vector<32x1xf32>
    %30 = tpu.reciprocal %29 : vector<32x1xf32> -> vector<32x1xf32>
    %31 = vector.broadcast %30 : vector<32x1xf32> to vector<32x5xf32>
    %32 = arith.mulf %27, %31 : vector<32x5xf32>
    %c0_15 = arith.constant 0 : index
    %c0_16 = arith.constant 0 : index
    %33 = vector.load %arg6[%c0_15, %c0_16] : memref<32x5xf32, #tpu.memory_space<vmem>>, vector<32x5xf32>
    tpu.vector_store %arg6[%c0_15, %c0_16], %32 {strides = array<i32>} : memref<32x5xf32, #tpu.memory_space<vmem>>, vector<32x5xf32>,
    return
  }
  func.func @transform_0(%arg0: i32) -> (i32, i32) {
    %c0_i32 = arith.constant 0 : i32
    %c0_i32_0 = arith.constant 0 : i32
    return %arg0, %c0_i32 : i32, i32
  }
  func.func @transform_1(%arg0: i32) -> (i32, i32) {
    %c0_i32 = arith.constant 0 : i32
    %c0_i32_0 = arith.constant 0 : i32
    %c0_i32_1 = arith.constant 0 : i32
    return %c0_i32, %c0_i32_0 : i32, i32
  }
  func.func @transform_2(%arg0: i32) -> (i32, i32) {
    %c0_i32 = arith.constant 0 : i32
    %c0_i32_0 = arith.constant 0 : i32
    %c0_i32_1 = arith.constant 0 : i32
    return %c0_i32, %c0_i32_0 : i32, i32
  }
  func.func @transform_3(%arg0: i32) -> (i32, i32) {
    %c0_i32 = arith.constant 0 : i32
    %c0_i32_0 = arith.constant 0 : i32
    %c0_i32_1 = arith.constant 0 : i32
    return %c0_i32, %c0_i32_0 : i32, i32
  }
  func.func @transform_4(%arg0: i32) -> (i32, i32) {
    %c0_i32 = arith.constant 0 : i32
    %c0_i32_0 = arith.constant 0 : i32
    %c0_i32_1 = arith.constant 0 : i32
    return %c0_i32, %c0_i32_0 : i32, i32
  }
  func.func @transform_5(%arg0: i32) -> (i32, i32) {
    %c0_i32 = arith.constant 0 : i32
    %c0_i32_0 = arith.constant 0 : i32
    return %arg0, %c0_i32 : i32, i32
  }
}

module attributes {stable_mosaic.version = 11 : i64} {
  func.func @mlp_infer_kernel(%arg0: i32, %arg1: memref<32x32xf32, #tpu.memory_space<vmem>>, %arg2: memref<32x32xf32, #tpu.memory_space<vmem>>, %arg3: memref<1x32xf32, #tpu.memory_space<vmem>>, %arg4: memref<32x5xf32, #tpu.memory_space<vmem>>, %arg5: memref<1x5xf32, #tpu.memory_space<vmem>>, %arg6: memref<32x5xf32, #tpu.memory_space<vmem>>) attributes {dimension_semantics = [#tpu.dimension_semantics<parallel>], iteration_bounds = array<i64: 2>, scalar_prefetch = 0 : i64, scratch_operands = 0 : i64, tpu.core_type = #tpu.core_type<tc>, window_params = [{transform_indices = @transform_0, window_bounds = array<i64: 32, 32>}, {pipeline_mode = #tpu.pipeline_mode<synchronous>, transform_indices = @transform_1, window_bounds = array<i64: 32, 32>}, {pipeline_mode = #tpu.pipeline_mode<synchronous>, transform_indices = @transform_2, window_bounds = array<i64: 1, 32>}, {pipeline_mode = #tpu.pipeline_mode<synchronous>, transform_indices = @transform_3, window_bounds = array<i64: 32, 5>}, {pipeline_mode = #tpu.pipeline_mode<synchronous>, transform_indices = @transform_4, window_bounds = array<i64: 1, 5>}, {transform_indices = @transform_5, window_bounds = array<i64: 32, 5>}]} {
    %c0 = arith.constant 0 : index
    %c0_0 = arith.constant 0 : index
    %0 = vector.load %arg1[%c0, %c0_0] : memref<32x32xf32, #tpu.memory_space<vmem>>, vector<32x32xf32>
    %c0_1 = arith.constant 0 : index
    %c0_2 = arith.constant 0 : index
    %1 = vector.load %arg2[%c0_1, %c0_2] : memref<32x32xf32, #tpu.memory_space<vmem>>, vector<32x32xf32>
    %cst = arith.constant dense<0.000000e+00> : vector<32x32xf32>
    %2 = tpu.matmul %0, %1, %cst {dimension_numbers = #tpu.dot_dimension_numbers<[1], [0], [0], [1], [0, 0, 1, 1], [], []>} : vector<32x32xf32>, vector<32x32xf32>, vector<32x32xf32> -> vector<32x32xf32>
    %c0_3 = arith.constant 0 : index
    %c0_4 = arith.constant 0 : index
    %3 = vector.load %arg3[%c0_3, %c0_4] : memref<1x32xf32, #tpu.memory_space<vmem>>, vector<1x32xf32>
    %4 = vector.broadcast %3 : vector<1x32xf32> to vector<32x32xf32>
    %5 = arith.addf %2, %4 : vector<32x32xf32>
    %cst_5 = arith.constant 0.000000e+00 : f32
    %6 = vector.broadcast %cst_5 : f32 to vector<32x32xf32>
    %7 = arith.subf %6, %5 : vector<32x32xf32>
    %8 = math.exp %7 : vector<32x32xf32>
    %cst_6 = arith.constant 1.000000e+00 : f32
    %9 = vector.broadcast %cst_6 : f32 to vector<32x32xf32>
    %10 = arith.addf %9, %8 : vector<32x32xf32>
    %11 = tpu.reciprocal %10 : vector<32x32xf32> -> vector<32x32xf32>
    %12 = math.exp %11 : vector<32x32xf32>
    %cst_7 = arith.constant dense<0.000000e+00> : vector<32xf32>
    %13 = vector.multi_reduction <add>, %12, %cst_7 [1] : vector<32x32xf32> to vector<32xf32>
    %14 = vector.shape_cast %13 : vector<32xf32> to vector<32x1xf32>
    %15 = tpu.reciprocal %14 : vector<32x1xf32> -> vector<32x1xf32>
    %16 = vector.broadcast %15 : vector<32x1xf32> to vector<32x32xf32>
    %17 = arith.mulf %12, %16 : vector<32x32xf32>
    %c0_8 = arith.constant 0 : index
    %c0_9 = arith.constant 0 : index
    %18 = vector.load %arg4[%c0_8, %c0_9] : memref<32x5xf32, #tpu.memory_space<vmem>>, vector<32x5xf32>
    %cst_10 = arith.constant dense<0.000000e+00> : vector<32x5xf32>
    %19 = tpu.matmul %17, %18, %cst_10 {dimension_numbers = #tpu.dot_dimension_numbers<[1], [0], [0], [1], [0, 0, 1, 1], [], []>} : vector<32x32xf32>, vector<32x5xf32>, vector<32x5xf32> -> vector<32x5xf32>
    %c0_11 = arith.constant 0 : index
    %c0_12 = arith.constant 0 : index
    %20 = vector.load %arg5[%c0_11, %c0_12] : memref<1x5xf32, #tpu.memory_space<vmem>>, vector<1x5xf32>
    %21 = vector.broadcast %20 : vector<1x5xf32> to vector<32x5xf32>
    %22 = arith.addf %19, %21 : vector<32x5xf32>
    %cst_13 = arith.constant dense<0xFF800000> : vector<32xf32>
    %23 = vector.multi_reduction <maximumf>, %22, %cst_13 [1] : vector<32x5xf32> to vector<32xf32>
    %24 = vector.shape_cast %23 : vector<32xf32> to vector<32x1xf32>
    %25 = vector.broadcast %24 : vector<32x1xf32> to vector<32x5xf32>
    %26 = arith.subf %22, %25 : vector<32x5xf32>
    %27 = math.exp %26 : vector<32x5xf32>
    %cst_14 = arith.constant dense<0.000000e+00> : vector<32xf32>
    %28 = vector.multi_reduction <add>, %27, %cst_14 [1] : vector<32x5xf32> to vector<32xf32>
    %29 = vector.shape_cast %28 : vector<32xf32> to vector<32x1xf32>
    %30 = tpu.reciprocal %29 : vector<32x1xf32> -> vector<32x1xf32>
    %31 = vector.broadcast %30 : vector<32x1xf32> to vector<32x5xf32>
    %32 = arith.mulf %27, %31 : vector<32x5xf32>
    %c0_15 = arith.constant 0 : index
    %c0_16 = arith.constant 0 : index
    %33 = vector.load %arg6[%c0_15, %c0_16] : memref<32x5xf32, #tpu.memory_space<vmem>>, vector<32x5xf32>
    tpu.vector_store %arg6[%c0_15, %c0_16], %32 {strides = array<i32>} : memref<32x5xf32, #tpu.memory_space<vmem>>, vector<32x5xf32>,
    return
  }
  func.func @transform_0(%arg0: i32) -> (i32, i32) {
    %c0_i32 = arith.constant 0 : i32
    %c0_i32_0 = arith.constant 0 : i32
    return %arg0, %c0_i32 : i32, i32
  }
  func.func @transform_1(%arg0: i32) -> (i32, i32) {
    %c0_i32 = arith.constant 0 : i32
    %c0_i32_0 = arith.constant 0 : i32
    %c0_i32_1 = arith.constant 0 : i32
    return %c0_i32, %c0_i32_0 : i32, i32
  }
  func.func @transform_2(%arg0: i32) -> (i32, i32) {
    %c0_i32 = arith.constant 0 : i32
    %c0_i32_0 = arith.constant 0 : i32
    %c0_i32_1 = arith.constant 0 : i32
    return %c0_i32, %c0_i32_0 : i32, i32
  }
  func.func @transform_3(%arg0: i32) -> (i32, i32) {
    %c0_i32 = arith.constant 0 : i32
    %c0_i32_0 = arith.constant 0 : i32
    %c0_i32_1 = arith.constant 0 : i32
    return %c0_i32, %c0_i32_0 : i32, i32
  }
  func.func @transform_4(%arg0: i32) -> (i32, i32) {
    %c0_i32 = arith.constant 0 : i32
    %c0_i32_0 = arith.constant 0 : i32
    %c0_i32_1 = arith.constant 0 : i32
    return %c0_i32, %c0_i32_0 : i32, i32
  }
  func.func @transform_5(%arg0: i32) -> (i32, i32) {
    %c0_i32 = arith.constant 0 : i32
    %c0_i32_0 = arith.constant 0 : i32
    return %arg0, %c0_i32 : i32, i32
  }
}

</mosaic_0001>

<bundles_post_ra>
// kernel: tpu_custom_call.1
= control target key start
LH: loop header
LB: loop body
LE: loop exit
PB: predicated region body
PF: predicated region fallthrough
CT: control target
= control target key end

     0   :  { %s761_s18 = smov 0   ;;  %s839_s0 = inlined_call_operand.vmem [shape: f32[64,32], index: 0, kind: input, shape index: {}]   ;;  %s840_s1 = inlined_call_operand.vmem [shape: f32[32,32], index: 1, kind: input, shape index: {}]   ;;  %s841_s2 = inlined_call_operand.vmem [shape: f32[1,32], index: 2, kind: input, shape index: {}]   ;;  %s842_s3 = inlined_call_operand.vmem [shape: f32[32,5], index: 3, kind: input, shape index: {}]   ;;  %s843_s4 = inlined_call_operand.vmem [shape: f32[1,5], index: 4, kind: input, shape index: {}]   ;;  %s844_s5 = inlined_call_operand.vmem [shape: f32[64,5], index: 5, kind: output, shape index: {}]  }
   0x1 LB: > { %s602_s19 = sadd.s32 4294967295, %s729_s18   ;;  %p606_p0 = scmp.ge.s32.totalorder %s729_s18, 1  ;;  %s729_s18 = sphi %s761_s18, %s15_s18  }
   0x2   : > { %p188_p1 = scmp.lt.s32.totalorder %s729_s18, 3 }
   0x4   : > { %p189_p2 = pnand %p606_p0, %p188_p1 }
   0x5   : > { %s607_s24 = sshll.u32 (!%p189_p2), %s602_s19, 2 }
   0x6   : > { %192 = sbr.rel (%p189_p2) target bundleno = 941 (0x3ad), region = 40  ;;  %p217_p3 = scmp.lt.s32.totalorder (!%p189_p2), %s607_s24, 7 }
   0xb   : > { %v235_v0 = vld [vmem:[%s840_s1 + $0x18] sm:$0xff]  ;;  %v234_v1 = vld [vmem:[%s840_s1 + $0x10] sm:$0xff]  ;;  %v233_v2 = vld [vmem:[%s840_s1 + $0x8] sm:$0xff]  ;;  %s846_s24 = smov (!%p217_p3, %s607_s24), 7  ;;  %vm243_vm0 = vcmask 261120   ;;  %vm497_vm1 = vcmask 39936  }
   0xc   : > { %639 = vmatprep.subr.mxu0 %v235_v0  ;;  %v232_v3 = vld [vmem:[%s840_s1] sm:$0xff]  ;;  %s608_s29 = sshll.u32 %s846_s24, 3  ;;  %v392_v49 = vld [vmem:[%s842_s3 + $0x18] sm:$0xff]  ;;  %v391_v50 = vld [vmem:[%s842_s3 + $0x10] sm:$0xff] }
   0xd   : > { %640 = vmatpush3.msra.mxu0 %v235_v0  ;;  %s220_s7 = scalar_lea.vmem %s839_s0, %s608_s29  ;;  %v611_v8 = vld [vmem:[%s841_s2] ss:$0 sm:$0xff]  ;;  %653 = vmatprep.subr.mxu1 %v392_v49  ;;  %v390_v51 = vld [vmem:[%s842_s3 + $0x8] sm:$0xff]  ;;  %s226_s23 = scalar_lea.vmem %s844_s5, %s608_s29 }
   0xe   : > { %641 = vmatprep.subr.mxu0 %v234_v1  ;;  %v228_v4 = vld [vmem:[%s220_s7] sm:$0xff]  ;;  %v229_v5 = vld [vmem:[%s220_s7 + $0x8] sm:$0xff]  ;;  %v230_v6 = vld [vmem:[%s220_s7 + $0x10] sm:$0xff]  ;;  %654 = vmatpush3.msra.mxu1 %v392_v49 }
   0xf   : > { %642 = vmatpush3.msra.mxu0 %v234_v1  ;;  %647 = vmatprep.mubr.msk.f32.mxu0 %vm243_vm0, %v228_v4  ;;  %v231_v7 = vld [vmem:[%s220_s7 + $0x18] sm:$0xff]  ;;  %v389_v52 = vld [vmem:[%s842_s3] sm:$0xff] }
  0x10   : > { %643 = vmatprep.subr.mxu0 %v233_v2  ;;  %655 = vmatprep.subr.mxu1 %v391_v50  ;;  %v616_v1 = vld [vmem:[%s843_s4] ss:$0 sm:$0xff] }
  0x11   : > { %644 = vmatpush3.msra.mxu0 %v233_v2  ;;  %656 = vmatpush3.msra.mxu1 %v391_v50 }
  0x12   : > { %645 = vmatprep.subr.mxu0 %v232_v3  ;;  %657 = vmatprep.subr.mxu1 %v390_v51 }
  0x13   : > { %646 = vmatpush3.msra.mxu0 %v232_v3  ;;  %658 = vmatpush3.msra.mxu1 %v390_v51 }
  0x14   : > { %648 = vmatmul.mubr.msk.f32.vlgmr.msra.gmra.mxu0 %vm243_vm0, %v229_v5  ;;  %659 = vmatprep.subr.mxu1 %v389_v52 }
  0x15   : > { %650 = vmatprep.mubr.msk.f32.mxu0 %vm243_vm0, %v230_v6  ;;  %660 = vmatpush3.msra.mxu1 %v389_v52 }
  0x18   : > { %651 = vmatmul.mubr.msk.f32.gmra.mxu0 %vm243_vm0, %v231_v7 }
  0xd4   : > { %v649_v9 = vpop.f32.mrf.mxu0 }
  0xd5   : > { %v328_v10 = vadd.f32 %v649_v9, %v611_v8 }
  0xd6   : > { %v322_v11 = vpop.f32.mrf.mxu0 }
  0xd7   : > { %v342_v12 = vsub.f32 0.0, %v328_v10  ;;  %v323_v13 = vadd.f32 %v611_v8, %v322_v11 }
  0xd8   : > { %v652_v14 = vpop.f32.mrf.mxu0 }
  0xd9   : > { %v347_v15 = vmul.f32 1.442695, %v342_v12  ;;  %v341_v16 = vsub.f32 0.0, %v323_v13  ;;  %v338_v17 = vadd.f32 %v652_v14, %v611_v8 }
  0xda   : > { %v332_v18 = vpop.f32.mrf.mxu0 }
  0xdb   : > { %675 = vpow2.f32 %v347_v15  ;;  %v345_v19 = vmul.f32 1.442695, %v341_v16  ;;  %v344_v20 = vsub.f32 0.0, %v338_v17  ;;  %v333_v21 = vadd.f32 %v611_v8, %v332_v18 }
  0xdd   : > { %677 = vpow2.f32 %v345_v19  ;;  %v351_v22 = vmul.f32 1.442695, %v344_v20  ;;  %v343_v23 = vsub.f32 0.0, %v333_v21 }
  0xdf   : > { %679 = vpow2.f32 %v351_v22  ;;  %v349_v24 = vmul.f32 1.442695, %v343_v23 }
  0xe1   : > { %681 = vpow2.f32 %v349_v24 }
  0xe8   : > { %v676_v25 = vpop.eup %675 }
  0xe9   : > { %v354_v26 = vadd.f32 1.0, %v676_v25 }
  0xea   : > { %v678_v27 = vpop.eup %677 }
  0xeb   : > { %683 = vrcp.f32 %v354_v26  ;;  %v353_v28 = vadd.f32 1.0, %v678_v27 }
  0xec   : > { %v680_v29 = vpop.eup %679 }
  0xed   : > { %685 = vrcp.f32 %v353_v28  ;;  %v356_v30 = vadd.f32 1.0, %v680_v29 }
  0xee   : > { %v682_v31 = vpop.eup %681 }
  0xef   : > { %687 = vrcp.f32 %v356_v30  ;;  %v355_v32 = vadd.f32 1.0, %v682_v31 }
  0xf1   : > { %689 = vrcp.f32 %v355_v32 }
  0xf8   : > { %v684_v33 = vpop.eup %683 }
  0xf9   : > { %v363_v35 = vmul.f32 1.442695, %v684_v33 }
  0xfa   : > { %v686_v34 = vpop.eup %685 }
  0xfb   : > { %v361_v36 = vmul.f32 1.442695, %v686_v34 }
  0xfc   : > { %v688_v37 = vpop.eup %687 }
  0xfd   : > { %691 = vpow2.f32 %v361_v36  ;;  %v367_v39 = vmul.f32 1.442695, %v688_v37 }
  0xfe   : > { %v690_v38 = vpop.eup %689  ;;  %693 = vpow2.f32 %v363_v35 }
  0xff   : > { %v365_v40 = vmul.f32 1.442695, %v690_v38 }
 0x101   : > { %695 = vpow2.f32 %v365_v40 }
 0x102   : > { %697 = vpow2.f32 %v367_v39 }
 0x10a   : > { %v692_v41 = vpop.eup %691 }
 0x10b   : > { %v369_v42 = vsel %vm243_vm0, %v692_v41, 0.0  ;;  %v694_v43 = vpop.eup %693 }
 0x10c   : > { %370 = vadd.xlane.f32.xlu0 %v369_v42  ;;  %v372_v46 = vsel %vm243_vm0, %v694_v43, 0.0 }
 0x10e   : > { %v696_v44 = vpop.eup %695 }
 0x10f   : > { %v375_v45 = vsel %vm243_vm0, %v696_v44, 0.0  ;;  %v698_v47 = vpop.eup %697 }
 0x110   : > { %376 = vadd.xlane.f32.xlu1 %v375_v45  ;;  %373 = vadd.xlane.f32.xlu0 %v372_v46  ;;  %v378_v48 = vsel %vm243_vm0, %v698_v47, 0.0 }
 0x114   : > { %379 = vadd.xlane.f32.xlu1 %v378_v48 }
 0x195   : > { %v371_v53 = vpop.xlane.xlu0 %370 }
 0x196   : > { %699 = vrcp.f32 %v371_v53 }
 0x199   : > { %v377_v54 = vpop.xlane.xlu1 %376  ;;  %v374_v55 = vpop.xlane.xlu0 %373 }
 0x19a   : > { %701 = vrcp.f32 %v377_v54 }
 0x19b   : > { %703 = vrcp.f32 %v374_v55 }
 0x19d   : > { %v380_v56 = vpop.xlane.xlu1 %379 }
 0x19e   : > { %705 = vrcp.f32 %v380_v56 }
 0x1a3   : > { %v700_v57 = vpop.eup %699 }
 0x1a4   : > { %v385_v58 = vmul.f32 %v700_v57, %v692_v41 }
 0x1a6   : > { %661 = vmatprep.mubr.msk.f32.mxu1 %vm243_vm0, %v385_v58 }
 0x1a7   : > { %v702_v59 = vpop.eup %701 }
 0x1a8   : > { %v704_v60 = vpop.eup %703  ;;  %v387_v61 = vmul.f32 %v702_v59, %v696_v44 }
 0x1a9   : > { %v386_v62 = vmul.f32 %v704_v60, %v694_v43 }
 0x1ab   : > { %v706_v63 = vpop.eup %705  ;;  %662 = vmatmul.mubr.msk.f32.vlgmr.msra.gmra.mxu1 %vm243_vm0, %v386_v62 }
 0x1ac   : > { %664 = vmatprep.mubr.msk.f32.mxu1 %vm243_vm0, %v387_v61  ;;  %v388_v0 = vmul.f32 %v706_v63, %v698_v47 }
 0x1af   : > { %665 = vmatmul.mubr.msk.f32.gmra.mxu1 %vm243_vm0, %v388_v0 }
 0x26b   : > { %v663_v2 = vpop.f32.mrf.mxu1 }
 0x26c   : > { %v484_v3 = vadd.f32 %v663_v2, %v616_v1 }
 0x26d   : > { %v478_v4 = vpop.f32.mrf.mxu1 }
 0x26e   : > { %v479_v5 = vadd.f32 %v616_v1, %v478_v4  ;;  %v501_v6 = vsel %vm497_vm1, %v484_v3, -inf }
 0x26f   : > { %502 = vmax.xlane.f32.xlu1 %v501_v6  ;;  %v666_v7 = vpop.f32.mrf.mxu1 }
 0x270   : > { %v494_v8 = vadd.f32 %v666_v7, %v616_v1  ;;  %v498_v9 = vsel %vm497_vm1, %v479_v5, -inf }
 0x271   : > { %v488_v10 = vpop.f32.mrf.mxu1  ;;  %499 = vmax.xlane.f32.xlu0 %v498_v9 }
 0x272   : > { %v489_v11 = vadd.f32 %v616_v1, %v488_v10  ;;  %v507_v12 = vsel %vm497_vm1, %v494_v8, -inf }
 0x273   : > { %508 = vmax.xlane.f32.xlu1 %v507_v12 }
 0x274   : > { %v504_v13 = vsel %vm497_vm1, %v489_v11, -inf }
 0x275   : > { %505 = vmax.xlane.f32.xlu0 %v504_v13 }
 0x2f8   : > { %v503_v14 = vpop.xlane.xlu1 %502 }
 0x2f9   : > { %v511_v15 = vsub.f32 %v484_v3, %v503_v14 }
 0x2fa   : > { %v500_v16 = vpop.xlane.xlu0 %499 }
 0x2fb   : > { %v516_v17 = vmul.f32 1.442695, %v511_v15  ;;  %v510_v18 = vsub.f32 %v479_v5, %v500_v16 }
 0x2fc   : > { %v509_v19 = vpop.xlane.xlu1 %508 }
 0x2fd   : > { %707 = vpow2.f32 %v516_v17  ;;  %v514_v20 = vmul.f32 1.442695, %v510_v18  ;;  %v513_v21 = vsub.f32 %v494_v8, %v509_v19 }
 0x2fe   : > { %v506_v22 = vpop.xlane.xlu0 %505 }
 0x2ff   : > { %709 = vpow2.f32 %v514_v20  ;;  %v520_v23 = vmul.f32 1.442695, %v513_v21  ;;  %v512_v24 = vsub.f32 %v489_v11, %v506_v22 }
 0x301   : > { %711 = vpow2.f32 %v520_v23  ;;  %v518_v25 = vmul.f32 1.442695, %v512_v24 }
 0x303   : > { %713 = vpow2.f32 %v518_v25 }
 0x30a   : > { %v708_v26 = vpop.eup %707 }
 0x30b   : > { %v525_v27 = vsel %vm497_vm1, %v708_v26, 0.0 }
 0x30c   : > { %v710_v28 = vpop.eup %709  ;;  %526 = vadd.xlane.f32.xlu1 %v525_v27 }
 0x30d   : > { %v522_v29 = vsel %vm497_vm1, %v710_v28, 0.0 }
 0x30e   : > { %v712_v30 = vpop.eup %711  ;;  %523 = vadd.xlane.f32.xlu0 %v522_v29 }
 0x30f   : > { %v531_v31 = vsel %vm497_vm1, %v712_v30, 0.0 }
 0x310   : > { %v714_v32 = vpop.eup %713  ;;  %532 = vadd.xlane.f32.xlu1 %v531_v31 }
 0x311   : > { %v528_v33 = vsel %vm497_vm1, %v714_v32, 0.0 }
 0x312   : > { %529 = vadd.xlane.f32.xlu0 %v528_v33 }
 0x395   : > { %v527_v34 = vpop.xlane.xlu1 %526 }
 0x396   : > { %715 = vrcp.f32 %v527_v34 }
 0x397   : > { %v524_v35 = vpop.xlane.xlu0 %523 }
 0x398   : > { %717 = vrcp.f32 %v524_v35 }
 0x399   : > { %v533_v36 = vpop.xlane.xlu1 %532 }
 0x39a   : > { %719 = vrcp.f32 %v533_v36 }
 0x39b   : > { %v530_v37 = vpop.xlane.xlu0 %529 }
 0x39c   : > { %721 = vrcp.f32 %v530_v37 }
 0x3a3   : > { %v716_v38 = vpop.eup %715 }
 0x3a4   : > { %v539_v41 = vmul.f32 %v716_v38, %v708_v26 }
 0x3a5   : > { %v718_v39 = vpop.eup %717 }
 0x3a6   : > { %v538_v40 = vmul.f32 %v718_v39, %v710_v28  ;;  %543 = vst.msk [vmem:[%s226_s23 + $0x8] sm:$0xff] %vm497_vm1, %v539_v41 }
 0x3a7   : > { %v720_v42 = vpop.eup %719 }
 0x3a8   : > { %542 = vst.msk [vmem:[%s226_s23] sm:$0xff] %vm497_vm1, %v538_v40  ;;  %v541_v45 = vmul.f32 %v720_v42, %v712_v30 }
 0x3a9   : > { %v722_v43 = vpop.eup %721 }
 0x3aa   : > { %v540_v44 = vmul.f32 %v722_v43, %v714_v32  ;;  %545 = vst.msk [vmem:[%s226_s23 + $0x18] sm:$0xff] %vm497_vm1, %v541_v45 }
 0x3ac   : > { %544 = vst.msk [vmem:[%s226_s23 + $0x10] sm:$0xff] %vm497_vm1, %v540_v44 }
 0x3ad PF: > { %s15_s18 = sadd.s32 1, %s729_s18  }
 0x3ae   : > { %p12_p4 = scmp.ge.s32.totalorder %s15_s18, 4  }
 0x3b0   :  { %14 = sbr.rel (!%p12_p4) target bundleno = 1 (0x1), region = 70 }

// kernel: tpu_custom_call.1
= control target key start
LH: loop header
LB: loop body
LE: loop exit
PB: predicated region body
PF: predicated region fallthrough
CT: control target
= control target key end

     0   :  { %s761_s18 = smov 0   ;;  %s839_s0 = inlined_call_operand.vmem [shape: f32[64,32], index: 0, kind: input, shape index: {}]   ;;  %s840_s1 = inlined_call_operand.vmem [shape: f32[32,32], index: 1, kind: input, shape index: {}]   ;;  %s841_s2 = inlined_call_operand.vmem [shape: f32[1,32], index: 2, kind: input, shape index: {}]   ;;  %s842_s3 = inlined_call_operand.vmem [shape: f32[32,5], index: 3, kind: input, shape index: {}]   ;;  %s843_s4 = inlined_call_operand.vmem [shape: f32[1,5], index: 4, kind: input, shape index: {}]   ;;  %s844_s5 = inlined_call_operand.vmem [shape: f32[64,5], index: 5, kind: output, shape index: {}]  }
   0x1 LB: > { %s602_s19 = sadd.s32 4294967295, %s729_s18   ;;  %p606_p0 = scmp.ge.s32.totalorder %s729_s18, 1  ;;  %s729_s18 = sphi %s761_s18, %s15_s18  }
   0x2   : > { %p188_p1 = scmp.lt.s32.totalorder %s729_s18, 3 }
   0x4   : > { %p189_p2 = pnand %p606_p0, %p188_p1 }
   0x5   : > { %s607_s24 = sshll.u32 (!%p189_p2), %s602_s19, 2 }
   0x6   : > { %192 = sbr.rel (%p189_p2) target bundleno = 941 (0x3ad), region = 40  ;;  %p217_p3 = scmp.lt.s32.totalorder (!%p189_p2), %s607_s24, 7 }
   0xb   : > { %v235_v0 = vld [vmem:[%s840_s1 + $0x18] sm:$0xff]  ;;  %v234_v1 = vld [vmem:[%s840_s1 + $0x10] sm:$0xff]  ;;  %v233_v2 = vld [vmem:[%s840_s1 + $0x8] sm:$0xff]  ;;  %s846_s24 = smov (!%p217_p3, %s607_s24), 7  ;;  %vm243_vm0 = vcmask 261120   ;;  %vm497_vm1 = vcmask 39936  }
   0xc   : > { %639 = vmatprep.subr.mxu0 %v235_v0  ;;  %v232_v3 = vld [vmem:[%s840_s1] sm:$0xff]  ;;  %s608_s29 = sshll.u32 %s846_s24, 3  ;;  %v392_v49 = vld [vmem:[%s842_s3 + $0x18] sm:$0xff]  ;;  %v391_v50 = vld [vmem:[%s842_s3 + $0x10] sm:$0xff] }
   0xd   : > { %640 = vmatpush3.msra.mxu0 %v235_v0  ;;  %s220_s7 = scalar_lea.vmem %s839_s0, %s608_s29  ;;  %v611_v8 = vld [vmem:[%s841_s2] ss:$0 sm:$0xff]  ;;  %653 = vmatprep.subr.mxu1 %v392_v49  ;;  %v390_v51 = vld [vmem:[%s842_s3 + $0x8] sm:$0xff]  ;;  %s226_s23 = scalar_lea.vmem %s844_s5, %s608_s29 }
   0xe   : > { %641 = vmatprep.subr.mxu0 %v234_v1  ;;  %v228_v4 = vld [vmem:[%s220_s7] sm:$0xff]  ;;  %v229_v5 = vld [vmem:[%s220_s7 + $0x8] sm:$0xff]  ;;  %v230_v6 = vld [vmem:[%s220_s7 + $0x10] sm:$0xff]  ;;  %654 = vmatpush3.msra.mxu1 %v392_v49 }
   0xf   : > { %642 = vmatpush3.msra.mxu0 %v234_v1  ;;  %647 = vmatprep.mubr.msk.f32.mxu0 %vm243_vm0, %v228_v4  ;;  %v231_v7 = vld [vmem:[%s220_s7 + $0x18] sm:$0xff]  ;;  %v389_v52 = vld [vmem:[%s842_s3] sm:$0xff] }
  0x10   : > { %643 = vmatprep.subr.mxu0 %v233_v2  ;;  %655 = vmatprep.subr.mxu1 %v391_v50  ;;  %v616_v1 = vld [vmem:[%s843_s4] ss:$0 sm:$0xff] }
  0x11   : > { %644 = vmatpush3.msra.mxu0 %v233_v2  ;;  %656 = vmatpush3.msra.mxu1 %v391_v50 }
  0x12   : > { %645 = vmatprep.subr.mxu0 %v232_v3  ;;  %657 = vmatprep.subr.mxu1 %v390_v51 }
  0x13   : > { %646 = vmatpush3.msra.mxu0 %v232_v3  ;;  %658 = vmatpush3.msra.mxu1 %v390_v51 }
  0x14   : > { %648 = vmatmul.mubr.msk.f32.vlgmr.msra.gmra.mxu0 %vm243_vm0, %v229_v5  ;;  %659 = vmatprep.subr.mxu1 %v389_v52 }
  0x15   : > { %650 = vmatprep.mubr.msk.f32.mxu0 %vm243_vm0, %v230_v6  ;;  %660 = vmatpush3.msra.mxu1 %v389_v52 }
  0x18   : > { %651 = vmatmul.mubr.msk.f32.gmra.mxu0 %vm243_vm0, %v231_v7 }
  0xd4   : > { %v649_v9 = vpop.f32.mrf.mxu0 }
  0xd5   : > { %v328_v10 = vadd.f32 %v649_v9, %v611_v8 }
  0xd6   : > { %v322_v11 = vpop.f32.mrf.mxu0 }
  0xd7   : > { %v342_v12 = vsub.f32 0.0, %v328_v10  ;;  %v323_v13 = vadd.f32 %v611_v8, %v322_v11 }
  0xd8   : > { %v652_v14 = vpop.f32.mrf.mxu0 }
  0xd9   : > { %v347_v15 = vmul.f32 1.442695, %v342_v12  ;;  %v341_v16 = vsub.f32 0.0, %v323_v13  ;;  %v338_v17 = vadd.f32 %v652_v14, %v611_v8 }
  0xda   : > { %v332_v18 = vpop.f32.mrf.mxu0 }
  0xdb   : > { %675 = vpow2.f32 %v347_v15  ;;  %v345_v19 = vmul.f32 1.442695, %v341_v16  ;;  %v344_v20 = vsub.f32 0.0, %v338_v17  ;;  %v333_v21 = vadd.f32 %v611_v8, %v332_v18 }
  0xdd   : > { %677 = vpow2.f32 %v345_v19  ;;  %v351_v22 = vmul.f32 1.442695, %v344_v20  ;;  %v343_v23 = vsub.f32 0.0, %v333_v21 }
  0xdf   : > { %679 = vpow2.f32 %v351_v22  ;;  %v349_v24 = vmul.f32 1.442695, %v343_v23 }
  0xe1   : > { %681 = vpow2.f32 %v349_v24 }
  0xe8   : > { %v676_v25 = vpop.eup %675 }
  0xe9   : > { %v354_v26 = vadd.f32 1.0, %v676_v25 }
  0xea   : > { %v678_v27 = vpop.eup %677 }
  0xeb   : > { %683 = vrcp.f32 %v354_v26  ;;  %v353_v28 = vadd.f32 1.0, %v678_v27 }
  0xec   : > { %v680_v29 = vpop.eup %679 }
  0xed   : > { %685 = vrcp.f32 %v353_v28  ;;  %v356_v30 = vadd.f32 1.0, %v680_v29 }
  0xee   : > { %v682_v31 = vpop.eup %681 }
  0xef   : > { %687 = vrcp.f32 %v356_v30  ;;  %v355_v32 = vadd.f32 1.0, %v682_v31 }
  0xf1   : > { %689 = vrcp.f32 %v355_v32 }
  0xf8   : > { %v684_v33 = vpop.eup %683 }
  0xf9   : > { %v363_v35 = vmul.f32 1.442695, %v684_v33 }
  0xfa   : > { %v686_v34 = vpop.eup %685 }
  0xfb   : > { %v361_v36 = vmul.f32 1.442695, %v686_v34 }
  0xfc   : > { %v688_v37 = vpop.eup %687 }
  0xfd   : > { %691 = vpow2.f32 %v361_v36  ;;  %v367_v39 = vmul.f32 1.442695, %v688_v37 }
  0xfe   : > { %v690_v38 = vpop.eup %689  ;;  %693 = vpow2.f32 %v363_v35 }
  0xff   : > { %v365_v40 = vmul.f32 1.442695, %v690_v38 }
 0x101   : > { %695 = vpow2.f32 %v365_v40 }
 0x102   : > { %697 = vpow2.f32 %v367_v39 }
 0x10a   : > { %v692_v41 = vpop.eup %691 }
 0x10b   : > { %v369_v42 = vsel %vm243_vm0, %v692_v41, 0.0  ;;  %v694_v43 = vpop.eup %693 }
 0x10c   : > { %370 = vadd.xlane.f32.xlu0 %v369_v42  ;;  %v372_v46 = vsel %vm243_vm0, %v694_v43, 0.0 }
 0x10e   : > { %v696_v44 = vpop.eup %695 }
 0x10f   : > { %v375_v45 = vsel %vm243_vm0, %v696_v44, 0.0  ;;  %v698_v47 = vpop.eup %697 }
 0x110   : > { %376 = vadd.xlane.f32.xlu1 %v375_v45  ;;  %373 = vadd.xlane.f32.xlu0 %v372_v46  ;;  %v378_v48 = vsel %vm243_vm0, %v698_v47, 0.0 }
 0x114   : > { %379 = vadd.xlane.f32.xlu1 %v378_v48 }
 0x195   : > { %v371_v53 = vpop.xlane.xlu0 %370 }
 0x196   : > { %699 = vrcp.f32 %v371_v53 }
 0x199   : > { %v377_v54 = vpop.xlane.xlu1 %376  ;;  %v374_v55 = vpop.xlane.xlu0 %373 }
 0x19a   : > { %701 = vrcp.f32 %v377_v54 }
 0x19b   : > { %703 = vrcp.f32 %v374_v55 }
 0x19d   : > { %v380_v56 = vpop.xlane.xlu1 %379 }
 0x19e   : > { %705 = vrcp.f32 %v380_v56 }
 0x1a3   : > { %v700_v57 = vpop.eup %699 }
 0x1a4   : > { %v385_v58 = vmul.f32 %v700_v57, %v692_v41 }
 0x1a6   : > { %661 = vmatprep.mubr.msk.f32.mxu1 %vm243_vm0, %v385_v58 }
 0x1a7   : > { %v702_v59 = vpop.eup %701 }
 0x1a8   : > { %v704_v60 = vpop.eup %703  ;;  %v387_v61 = vmul.f32 %v702_v59, %v696_v44 }
 0x1a9   : > { %v386_v62 = vmul.f32 %v704_v60, %v694_v43 }
 0x1ab   : > { %v706_v63 = vpop.eup %705  ;;  %662 = vmatmul.mubr.msk.f32.vlgmr.msra.gmra.mxu1 %vm243_vm0, %v386_v62 }
 0x1ac   : > { %664 = vmatprep.mubr.msk.f32.mxu1 %vm243_vm0, %v387_v61  ;;  %v388_v0 = vmul.f32 %v706_v63, %v698_v47 }
 0x1af   : > { %665 = vmatmul.mubr.msk.f32.gmra.mxu1 %vm243_vm0, %v388_v0 }
 0x26b   : > { %v663_v2 = vpop.f32.mrf.mxu1 }
 0x26c   : > { %v484_v3 = vadd.f32 %v663_v2, %v616_v1 }
 0x26d   : > { %v478_v4 = vpop.f32.mrf.mxu1 }
 0x26e   : > { %v479_v5 = vadd.f32 %v616_v1, %v478_v4  ;;  %v501_v6 = vsel %vm497_vm1, %v484_v3, -inf }
 0x26f   : > { %502 = vmax.xlane.f32.xlu1 %v501_v6  ;;  %v666_v7 = vpop.f32.mrf.mxu1 }
 0x270   : > { %v494_v8 = vadd.f32 %v666_v7, %v616_v1  ;;  %v498_v9 = vsel %vm497_vm1, %v479_v5, -inf }
 0x271   : > { %v488_v10 = vpop.f32.mrf.mxu1  ;;  %499 = vmax.xlane.f32.xlu0 %v498_v9 }
 0x272   : > { %v489_v11 = vadd.f32 %v616_v1, %v488_v10  ;;  %v507_v12 = vsel %vm497_vm1, %v494_v8, -inf }
 0x273   : > { %508 = vmax.xlane.f32.xlu1 %v507_v12 }
 0x274   : > { %v504_v13 = vsel %vm497_vm1, %v489_v11, -inf }
 0x275   : > { %505 = vmax.xlane.f32.xlu0 %v504_v13 }
 0x2f8   : > { %v503_v14 = vpop.xlane.xlu1 %502 }
 0x2f9   : > { %v511_v15 = vsub.f32 %v484_v3, %v503_v14 }
 0x2fa   : > { %v500_v16 = vpop.xlane.xlu0 %499 }
 0x2fb   : > { %v516_v17 = vmul.f32 1.442695, %v511_v15  ;;  %v510_v18 = vsub.f32 %v479_v5, %v500_v16 }
 0x2fc   : > { %v509_v19 = vpop.xlane.xlu1 %508 }
 0x2fd   : > { %707 = vpow2.f32 %v516_v17  ;;  %v514_v20 = vmul.f32 1.442695, %v510_v18  ;;  %v513_v21 = vsub.f32 %v494_v8, %v509_v19 }
 0x2fe   : > { %v506_v22 = vpop.xlane.xlu0 %505 }
 0x2ff   : > { %709 = vpow2.f32 %v514_v20  ;;  %v520_v23 = vmul.f32 1.442695, %v513_v21  ;;  %v512_v24 = vsub.f32 %v489_v11, %v506_v22 }
 0x301   : > { %711 = vpow2.f32 %v520_v23  ;;  %v518_v25 = vmul.f32 1.442695, %v512_v24 }
 0x303   : > { %713 = vpow2.f32 %v518_v25 }
 0x30a   : > { %v708_v26 = vpop.eup %707 }
 0x30b   : > { %v525_v27 = vsel %vm497_vm1, %v708_v26, 0.0 }
 0x30c   : > { %v710_v28 = vpop.eup %709  ;;  %526 = vadd.xlane.f32.xlu1 %v525_v27 }
 0x30d   : > { %v522_v29 = vsel %vm497_vm1, %v710_v28, 0.0 }
 0x30e   : > { %v712_v30 = vpop.eup %711  ;;  %523 = vadd.xlane.f32.xlu0 %v522_v29 }
 0x30f   : > { %v531_v31 = vsel %vm497_vm1, %v712_v30, 0.0 }
 0x310   : > { %v714_v32 = vpop.eup %713  ;;  %532 = vadd.xlane.f32.xlu1 %v531_v31 }
 0x311   : > { %v528_v33 = vsel %vm497_vm1, %v714_v32, 0.0 }
 0x312   : > { %529 = vadd.xlane.f32.xlu0 %v528_v33 }
 0x395   : > { %v527_v34 = vpop.xlane.xlu1 %526 }
 0x396   : > { %715 = vrcp.f32 %v527_v34 }
 0x397   : > { %v524_v35 = vpop.xlane.xlu0 %523 }
 0x398   : > { %717 = vrcp.f32 %v524_v35 }
 0x399   : > { %v533_v36 = vpop.xlane.xlu1 %532 }
 0x39a   : > { %719 = vrcp.f32 %v533_v36 }
 0x39b   : > { %v530_v37 = vpop.xlane.xlu0 %529 }
 0x39c   : > { %721 = vrcp.f32 %v530_v37 }
 0x3a3   : > { %v716_v38 = vpop.eup %715 }
 0x3a4   : > { %v539_v41 = vmul.f32 %v716_v38, %v708_v26 }
 0x3a5   : > { %v718_v39 = vpop.eup %717 }
 0x3a6   : > { %v538_v40 = vmul.f32 %v718_v39, %v710_v28  ;;  %543 = vst.msk [vmem:[%s226_s23 + $0x8] sm:$0xff] %vm497_vm1, %v539_v41 }
 0x3a7   : > { %v720_v42 = vpop.eup %719 }
 0x3a8   : > { %542 = vst.msk [vmem:[%s226_s23] sm:$0xff] %vm497_vm1, %v538_v40  ;;  %v541_v45 = vmul.f32 %v720_v42, %v712_v30 }
 0x3a9   : > { %v722_v43 = vpop.eup %721 }
 0x3aa   : > { %v540_v44 = vmul.f32 %v722_v43, %v714_v32  ;;  %545 = vst.msk [vmem:[%s226_s23 + $0x18] sm:$0xff] %vm497_vm1, %v541_v45 }
 0x3ac   : > { %544 = vst.msk [vmem:[%s226_s23 + $0x10] sm:$0xff] %vm497_vm1, %v540_v44 }
 0x3ad PF: > { %s15_s18 = sadd.s32 1, %s729_s18  }
 0x3ae   : > { %p12_p4 = scmp.ge.s32.totalorder %s15_s18, 4  }
 0x3b0   :  { %14 = sbr.rel (!%p12_p4) target bundleno = 1 (0x1), region = 70 }

</bundles_post_ra>
